<compile_context>
chip_gen: v5e
topology: v5e:2x2
jax: 0.10.0
libtpu: 0.0.40
codegen_flags: <defaults>
</compile_context>

<pallas_src>
import jax
import jax.numpy as jnp
import numpy as np
from jax.experimental import pallas as pl
from jax.experimental.pallas import tpu as pltpu

STR_LEN = 32          # configs['str_len']
NEG_SLOPE = 0.2       # LeakyReLU negative slope


def _leaky_relu(x):
    return jnp.where(x >= 0, x, NEG_SLOPE * x)


def _l2r_kernel(x_ref, w1_ref, b1_ref, w2_ref, b2_ref, w3_ref, b3_ref, o_ref):
    """One batch tile of the ML_learning2Rank forward; everything stays in VMEM.

    x:  [TB, N]   w1, w2: [N, N]   b1, b2: [1, N]
    w3: [1, N]  (PyTorch Linear(N,1).weight laid out as a row)   b3: [1, 1]
    out: [TB, 1]
    """
    x = x_ref[...]
    # Linear 1 + (Dropout = identity in eval) + LeakyReLU(0.2)
    h = jnp.dot(x, w1_ref[...], preferred_element_type=jnp.float32) + b1_ref[...]
    h = _leaky_relu(h)
    # Linear 2 + (Dropout = identity in eval) + LeakyReLU(0.2)
    h = jnp.dot(h, w2_ref[...], preferred_element_type=jnp.float32) + b2_ref[...]
    h = _leaky_relu(h)
    # Linear 3 (N -> 1) as a lane reduction, then Sigmoid.
    y = jnp.sum(h * w3_ref[...], axis=-1, keepdims=True) + b3_ref[...]
    o_ref[...] = 1.0 / (1.0 + jnp.exp(-y))
    # TODO(synk): training-mode Dropout(0.2) would need pltpu.prng_seed /
    #             pltpu.prng_random_bits in-kernel; forward here is eval-mode.


def ml_learning2rank(str_feature, params, *, block_b=512):
    """str_feature: [B, STR_LEN] -> [B, 1] rank score in (0, 1)."""
    B, N = str_feature.shape

    # Batch tile: whole batch if small, otherwise `block_b` rows (multiple of 8
    # sublanes).  Pad B up to a multiple of the tile; slice the result back.
    tb = B if B <= block_b else block_b
    n_tiles = pl.cdiv(B, tb)
    Bp = n_tiles * tb
    x = str_feature
    if Bp != B:
        x = jnp.pad(x, ((0, Bp - B), (0, 0)))

    out = pl.pallas_call(
        _l2r_kernel,
        out_shape=jax.ShapeDtypeStruct((Bp, 1), jnp.float32),
        grid_spec=pltpu.PrefetchScalarGridSpec(
            num_scalar_prefetch=0,
            grid=(n_tiles,),
            in_specs=[
                pl.BlockSpec((tb, N), lambda i: (i, 0)),   # x  (tiled over batch)
                pl.BlockSpec((N, N), lambda i: (0, 0)),    # w1 (resident)
                pl.BlockSpec((1, N), lambda i: (0, 0)),    # b1
                pl.BlockSpec((N, N), lambda i: (0, 0)),    # w2
                pl.BlockSpec((1, N), lambda i: (0, 0)),    # b2
                pl.BlockSpec((1, N), lambda i: (0, 0)),    # w3 (row layout)
                pl.BlockSpec((1, 1), lambda i: (0, 0)),    # b3
            ],
            out_specs=pl.BlockSpec((tb, 1), lambda i: (i, 0)),
        ),
        compiler_params=pltpu.CompilerParams(
            dimension_semantics=("parallel",)),
    )(x,
      params["w1"], params["b1"],
      params["w2"], params["b2"],
      params["w3"], params["b3"])

    return out[:B]


# Pure-JAX reference (mirrors the PyTorch module in eval mode), for sanity checks.
def _reference(x, p):
    h = x @ p["w1"] + p["b1"]
    h = jnp.where(h >= 0, h, NEG_SLOPE * h)
    h = h @ p["w2"] + p["b2"]
    h = jnp.where(h >= 0, h, NEG_SLOPE * h)
    y = jnp.sum(h * p["w3"], axis=-1, keepdims=True) + p["b3"]
    return 1.0 / (1.0 + jnp.exp(-y))


def _init_linear(key, fan_in, fan_out):
    """PyTorch nn.Linear default init: U(-1/sqrt(fan_in), 1/sqrt(fan_in))."""
    kw, kb = jax.random.split(key)
    lim = 1.0 / np.sqrt(fan_in)
    w = jax.random.uniform(kw, (fan_in, fan_out), jnp.float32, -lim, lim)
    b = jax.random.uniform(kb, (1, fan_out), jnp.float32, -lim, lim)
    return w, b


if __name__ == "__main__":
    key = jax.random.PRNGKey(0)
    k_x, k_x2, k1, k2, k3 = jax.random.split(key, 5)

    B, N = 8, STR_LEN
    str_feature = jax.random.normal(k_x, (B, N), jnp.float32)

    w1, b1 = _init_linear(k1, N, N)
    w2, b2 = _init_linear(k2, N, N)
    w3_col, b3 = _init_linear(k3, N, 1)
    params = {
        "w1": w1, "b1": b1,
        "w2": w2, "b2": b2,
        "w3": w3_col.T,          # store Linear(N,1) weight as a [1, N] row
        "b3": b3,                # [1, 1]
    }

    fwd = jax.jit(ml_learning2rank)

    # Small-batch check (single grid step).
    out = fwd(str_feature, params)
    jax.block_until_ready(out)
    ref = _reference(str_feature, params)
    assert out.shape == (B, 1)
    assert bool(jnp.all(jnp.isfinite(out)))
    assert bool(jnp.all((out > 0.0) & (out < 1.0)))          # sigmoid range
    assert np.allclose(np.asarray(out), np.asarray(ref), rtol=1e-5, atol=1e-5)

    # Larger, non-tile-aligned batch check (exercises batch tiling + padding).
    B2 = 1000
    str_feature2 = jax.random.normal(k_x2, (B2, N), jnp.float32)
    out2 = fwd(str_feature2, params)
    jax.block_until_ready(out2)
    ref2 = _reference(str_feature2, params)
    assert out2.shape == (B2, 1)
    assert np.allclose(np.asarray(out2), np.asarray(ref2), rtol=1e-5, atol=1e-5)

    print("KERNEL_OK")
</pallas_src>

<mosaic_0001>
module attributes {stable_mosaic.version = 11 : i64} {
  func.func @_l2r_kernel(%arg0: i32, %arg1: memref<8x32xf32, #tpu.memory_space<vmem>>, %arg2: memref<32x32xf32, #tpu.memory_space<vmem>>, %arg3: memref<1x32xf32, #tpu.memory_space<vmem>>, %arg4: memref<32x32xf32, #tpu.memory_space<vmem>>, %arg5: memref<1x32xf32, #tpu.memory_space<vmem>>, %arg6: memref<1x32xf32, #tpu.memory_space<vmem>>, %arg7: memref<1x1xf32, #tpu.memory_space<vmem>>, %arg8: memref<8x1xf32, #tpu.memory_space<vmem>>) attributes {dimension_semantics = [#tpu.dimension_semantics<parallel>], iteration_bounds = array<i64: 1>, scalar_prefetch = 0 : i64, scratch_operands = 0 : i64, tpu.core_type = #tpu.core_type<tc>, window_params = [{transform_indices = @transform_0, window_bounds = array<i64: 8, 32>}, {pipeline_mode = #tpu.pipeline_mode<synchronous>, transform_indices = @transform_1, window_bounds = array<i64: 32, 32>}, {pipeline_mode = #tpu.pipeline_mode<synchronous>, transform_indices = @transform_2, window_bounds = array<i64: 1, 32>}, {pipeline_mode = #tpu.pipeline_mode<synchronous>, transform_indices = @transform_3, window_bounds = array<i64: 32, 32>}, {pipeline_mode = #tpu.pipeline_mode<synchronous>, transform_indices = @transform_4, window_bounds = array<i64: 1, 32>}, {pipeline_mode = #tpu.pipeline_mode<synchronous>, transform_indices = @transform_5, window_bounds = array<i64: 1, 32>}, {pipeline_mode = #tpu.pipeline_mode<synchronous>, transform_indices = @transform_6, window_bounds = array<i64: 1, 1>}, {transform_indices = @transform_7, window_bounds = array<i64: 8, 1>}]} {
    %c0 = arith.constant 0 : index
    %c0_0 = arith.constant 0 : index
    %0 = vector.load %arg1[%c0, %c0_0] : memref<8x32xf32, #tpu.memory_space<vmem>>, vector<8x32xf32>
    %c0_1 = arith.constant 0 : index
    %c0_2 = arith.constant 0 : index
    %1 = vector.load %arg2[%c0_1, %c0_2] : memref<32x32xf32, #tpu.memory_space<vmem>>, vector<32x32xf32>
    %cst = arith.constant dense<0.000000e+00> : vector<8x32xf32>
    %2 = tpu.matmul %0, %1, %cst {dimension_numbers = #tpu.dot_dimension_numbers<[1], [0], [0], [1], [0, 0, 1, 1], [], []>} : vector<8x32xf32>, vector<32x32xf32>, vector<8x32xf32> -> vector<8x32xf32>
    %c0_3 = arith.constant 0 : index
    %c0_4 = arith.constant 0 : index
    %3 = vector.load %arg3[%c0_3, %c0_4] : memref<1x32xf32, #tpu.memory_space<vmem>>, vector<1x32xf32>
    %4 = vector.broadcast %3 : vector<1x32xf32> to vector<8x32xf32>
    %5 = arith.addf %2, %4 : vector<8x32xf32>
    %cst_5 = arith.constant 0.000000e+00 : f32
    %6 = vector.broadcast %cst_5 : f32 to vector<8x32xf32>
    %7 = arith.cmpf oge, %5, %6 : vector<8x32xf32>
    %cst_6 = arith.constant 2.000000e-01 : f32
    %8 = vector.broadcast %cst_6 : f32 to vector<8x32xf32>
    %9 = arith.mulf %8, %5 : vector<8x32xf32>
    %10 = arith.select %7, %5, %9 : vector<8x32xi1>, vector<8x32xf32>
    %c0_7 = arith.constant 0 : index
    %c0_8 = arith.constant 0 : index
    %11 = vector.load %arg4[%c0_7, %c0_8] : memref<32x32xf32, #tpu.memory_space<vmem>>, vector<32x32xf32>
    %cst_9 = arith.constant dense<0.000000e+00> : vector<8x32xf32>
    %12 = tpu.matmul %10, %11, %cst_9 {dimension_numbers = #tpu.dot_dimension_numbers<[1], [0], [0], [1], [0, 0, 1, 1], [], []>} : vector<8x32xf32>, vector<32x32xf32>, vector<8x32xf32> -> vector<8x32xf32>
    %c0_10 = arith.constant 0 : index
    %c0_11 = arith.constant 0 : index
    %13 = vector.load %arg5[%c0_10, %c0_11] : memref<1x32xf32, #tpu.memory_space<vmem>>, vector<1x32xf32>
    %14 = vector.broadcast %13 : vector<1x32xf32> to vector<8x32xf32>
    %15 = arith.addf %12, %14 : vector<8x32xf32>
    %cst_12 = arith.constant 0.000000e+00 : f32
    %16 = vector.broadcast %cst_12 : f32 to vector<8x32xf32>
    %17 = arith.cmpf oge, %15, %16 : vector<8x32xf32>
    %cst_13 = arith.constant 2.000000e-01 : f32
    %18 = vector.broadcast %cst_13 : f32 to vector<8x32xf32>
    %19 = arith.mulf %18, %15 : vector<8x32xf32>
    %20 = arith.select %17, %15, %19 : vector<8x32xi1>, vector<8x32xf32>
    %c0_14 = arith.constant 0 : index
    %c0_15 = arith.constant 0 : index
    %21 = vector.load %arg6[%c0_14, %c0_15] : memref<1x32xf32, #tpu.memory_space<vmem>>, vector<1x32xf32>
    %22 = vector.broadcast %21 : vector<1x32xf32> to vector<8x32xf32>
    %23 = arith.mulf %20, %22 : vector<8x32xf32>
    %cst_16 = arith.constant dense<0.000000e+00> : vector<8xf32>
    %24 = vector.multi_reduction <add>, %23, %cst_16 [1] : vector<8x32xf32> to vector<8xf32>
    %25 = vector.shape_cast %24 : vector<8xf32> to vector<8x1xf32>
    %c0_17 = arith.constant 0 : index
    %c0_18 = arith.constant 0 : index
    %26 = vector.load %arg7[%c0_17, %c0_18] : memref<1x1xf32, #tpu.memory_space<vmem>>, vector<1x1xf32>
    %27 = vector.broadcast %26 : vector<1x1xf32> to vector<8x1xf32>
    %28 = arith.addf %25, %27 : vector<8x1xf32>
    %cst_19 = arith.constant 0.000000e+00 : f32
    %29 = vector.broadcast %cst_19 : f32 to vector<8x1xf32>
    %30 = arith.subf %29, %28 : vector<8x1xf32>
    %31 = math.exp %30 : vector<8x1xf32>
    %cst_20 = arith.constant 1.000000e+00 : f32
    %32 = vector.broadcast %cst_20 : f32 to vector<8x1xf32>
    %33 = arith.addf %32, %31 : vector<8x1xf32>
    %cst_21 = arith.constant 1.000000e+00 : f32
    %34 = vector.broadcast %cst_21 : f32 to vector<8x1xf32>
    %35 = arith.divf %34, %33 : vector<8x1xf32>
    %c0_22 = arith.constant 0 : index
    %c0_23 = arith.constant 0 : index
    %36 = vector.load %arg8[%c0_22, %c0_23] : memref<8x1xf32, #tpu.memory_space<vmem>>, vector<8x1xf32>
    tpu.vector_store %arg8[%c0_22, %c0_23], %35 {strides = array<i32>} : memref<8x1xf32, #tpu.memory_space<vmem>>, vector<8x1xf32>,
    return
  }
  func.func @transform_0(%arg0: i32) -> (i32, i32) {
    %c0_i32 = arith.constant 0 : i32
    %c0_i32_0 = arith.constant 0 : i32
    return %arg0, %c0_i32 : i32, i32
  }
  func.func @transform_1(%arg0: i32) -> (i32, i32) {
    %c0_i32 = arith.constant 0 : i32
    %c0_i32_0 = arith.constant 0 : i32
    %c0_i32_1 = arith.constant 0 : i32
    return %c0_i32, %c0_i32_0 : i32, i32
  }
  func.func @transform_2(%arg0: i32) -> (i32, i32) {
    %c0_i32 = arith.constant 0 : i32
    %c0_i32_0 = arith.constant 0 : i32
    %c0_i32_1 = arith.constant 0 : i32
    return %c0_i32, %c0_i32_0 : i32, i32
  }
  func.func @transform_3(%arg0: i32) -> (i32, i32) {
    %c0_i32 = arith.constant 0 : i32
    %c0_i32_0 = arith.constant 0 : i32
    %c0_i32_1 = arith.constant 0 : i32
    return %c0_i32, %c0_i32_0 : i32, i32
  }
  func.func @transform_4(%arg0: i32) -> (i32, i32) {
    %c0_i32 = arith.constant 0 : i32
    %c0_i32_0 = arith.constant 0 : i32
    %c0_i32_1 = arith.constant 0 : i32
    return %c0_i32, %c0_i32_0 : i32, i32
  }
  func.func @transform_5(%arg0: i32) -> (i32, i32) {
    %c0_i32 = arith.constant 0 : i32
    %c0_i32_0 = arith.constant 0 : i32
    %c0_i32_1 = arith.constant 0 : i32
    return %c0_i32, %c0_i32_0 : i32, i32
  }
  func.func @transform_6(%arg0: i32) -> (i32, i32) {
    %c0_i32 = arith.constant 0 : i32
    %c0_i32_0 = arith.constant 0 : i32
    %c0_i32_1 = arith.constant 0 : i32
    return %c0_i32, %c0_i32_0 : i32, i32
  }
  func.func @transform_7(%arg0: i32) -> (i32, i32) {
    %c0_i32 = arith.constant 0 : i32
    %c0_i32_0 = arith.constant 0 : i32
    return %arg0, %c0_i32 : i32, i32
  }
}

</mosaic_0001>

<bundles_post_ra>
// kernel: ml_learning2rank.1
= control target key start
LH: loop header
LB: loop body
LE: loop exit
PB: predicated region body
PF: predicated region fallthrough
CT: control target
= control target key end

     0   :  { %s346_s0 = inlined_call_operand.hbm [shape: f32[8,32], index: 0, kind: input, shape index: {}]   ;;  %s347_s1 = inlined_call_operand.hbm [shape: f32[32,32], index: 1, kind: input, shape index: {}]   ;;  %s348_s2 = inlined_call_operand.vmem [shape: f32[1,32], index: 2, kind: input, shape index: {}]   ;;  %s349_s3 = inlined_call_operand.hbm [shape: f32[32,32], index: 3, kind: input, shape index: {}]   ;;  %s350_s4 = inlined_call_operand.vmem [shape: f32[1,32], index: 4, kind: input, shape index: {}]   ;;  %s351_s5 = inlined_call_operand.vmem [shape: f32[1,32], index: 5, kind: input, shape index: {}]   ;;  %s352_s6 = inlined_call_operand.<no memory space> [shape: f32[1,1], index: 6, kind: input, shape index: {}]   ;;  %s353_s7 = inlined_call_operand.vmem [shape: f32[8,1], index: 7, kind: output, shape index: {}]  }
   0x1   :  { %v12_v0 = vstv %s352_s6 }
   0x2   :  { %13 = vst [vmem:[#allocation2] sm:$0x1] %v12_v0 }
   0x3   :  { %14 = vsyncpa [#allocation4], 0 }
   0x4   :  { %15 = vsyncpa [#allocation6], 0  ;;  %s31_s28 = sshll.u32 %s347_s1, 4  ;;  %s274_s29 = smov [#allocation5]   ;;  %s32_s28 = int_to_ptr.hbm [resolvable:$true] %s31_s28 }
   0x5   :  { %s33_s30 = sshll.u32 %s274_s29, 4  ;;  %s21_s10 = sshll.u32 %s346_s0, 4  ;;  %s34_s30 = int_to_ptr.vmem [resolvable:$true] %s33_s30  ;;  %s22_s10 = int_to_ptr.hbm [resolvable:$true] %s21_s10 }
   0x6   :  { %s275_s11 = smov 128   ;;  %s276_s12 = smov 8  }
   0x7   :  { %39 = dma.hbm_to_vmem [thread:$0]  %s32_s28, 512, %s34_s30, [#allocation6], %s275_s11, %s275_s11, %s276_s12  }
   0x8   :  { %s277_s6 = smov [#allocation3]   ;;  %s46_s16 = sshll.u32 %s349_s3, 4  ;;  %s47_s16 = int_to_ptr.hbm [resolvable:$true] %s46_s16 }
   0x9   :  { %s23_s13 = sshll.u32 %s277_s6, 4  ;;  %s278_s1 = smov [#allocation7]   ;;  %s24_s13 = int_to_ptr.vmem [resolvable:$true] %s23_s13 }
   0xa   :  { %26 = dma.hbm_to_vmem [thread:$0]  %s22_s10, 128, %s24_s13, [#allocation4]  }
   0xb   :  { %s48_s17 = sshll.u32 %s278_s1, 4  ;;  %s49_s17 = int_to_ptr.vmem [resolvable:$true] %s48_s17 }
   0xc   :  { %54 = dma.hbm_to_vmem [thread:$0]  %s47_s16, 512, %s49_s17, [#allocation6], %s275_s11, %s275_s11, %s276_s12  }
   0xd   :  { %270 = dma.done.wait [#allocation4], 128  }
   0xe   :  { %271 = vsyncadd [#allocation4], 4294967168 }
   0xf   :  { %272 = dma.done.wait [#allocation6], 1024  }
  0x10   :  { %273 = vsyncadd [#allocation6], 4294966272  ;;  %v77_v1 = vld [vmem:[#allocation5 + $0x18] sm:$0xff]  ;;  %v76_v2 = vld [vmem:[#allocation5 + $0x10] sm:$0xff]  ;;  %vm82_vm0 = vcmask 261120   ;;  %vm175_vm6 = vcmask 7168  }
  0x11   :  { %98 = vmatpush.msra.mxu0 %v77_v1  ;;  %v112_v3 = vld [vmem:[#allocation7 + $0x18] sm:$0xff]  ;;  %v75_v4 = vld [vmem:[#allocation5 + $0x8] sm:$0xff]  ;;  %v74_v5 = vld [vmem:[#allocation5] sm:$0xff] }
  0x12   :  { %132 = vmatpush.msra.mxu1 %v112_v3  ;;  %v73_v6 = vld [vmem:[#allocation3] sm:$0xff]  ;;  %v111_v7 = vld [vmem:[#allocation7 + $0x10] sm:$0xff]  ;;  %v110_v8 = vld [vmem:[#allocation7 + $0x8] sm:$0xff] }
  0x13   :  { %99 = vmatpush.msra.mxu0 %v76_v2  ;;  %v109_v9 = vld [vmem:[#allocation7] sm:$0xff]  ;;  %v190_v10 = vld [vmem:[%s348_s2] ss:$0 sm:$0xff] }
  0x14   :  { %133 = vmatpush.msra.mxu1 %v111_v7  ;;  %v191_v15 = vld [vmem:[%s350_s4] ss:$0 sm:$0xff] }
  0x15   :  { %100 = vmatpush.msra.mxu0 %v75_v4  ;;  %v192_v18 = vld [vmem:[%s351_s5] ss:$0 sm:$0xff] }
  0x16   :  { %134 = vmatpush.msra.mxu1 %v110_v8  ;;  %v193_v23 = vld [vmem:[#allocation2] ss:$0 sm:$0xff] }
  0x17   :  { %101 = vmatpush.msra.mxu0 %v74_v5 }
  0x18   :  { %183 = vmatmul.msk.f32.vlgmr.msra.gmra.mxu0 %vm82_vm0, %v73_v6  ;;  %135 = vmatpush.msra.mxu1 %v109_v9 }
  0x95   :  { %v103_v11 = vpop.f32.mrf.mxu0 }
  0x96   :  { %v104_v12 = vadd.f32 %v190_v10, %v103_v11 }
  0x98   :  { %v107_v13 = vmul.f32 0.2, %v104_v12  ;;  %vm106_vm1 = vcmp.ge.f32.partialorder %v104_v12, 0.0 }
  0x9a   :  { %v108_v14 = vsel %vm106_vm1, %v104_v12, %v107_v13 }
  0x9b   :  { %184 = vmatmul.msk.f32.vlgmr.msra.gmra.mxu1 %vm82_vm0, %v108_v14 }
 0x118   :  { %v137_v16 = vpop.f32.mrf.mxu1 }
 0x119   :  { %v138_v17 = vadd.f32 %v191_v15, %v137_v16 }
 0x11b   :  { %v141_v19 = vmul.f32 0.2, %v138_v17  ;;  %vm140_vm2 = vcmp.ge.f32.partialorder %v138_v17, 0.0 }
 0x11d   :  { %v142_v20 = vsel %vm140_vm2, %v138_v17, %v141_v19 }
 0x11e   :  { %v147_v21 = vmul.f32 %v192_v18, %v142_v20 }
 0x120   :  { %v148_v22 = vsel %vm82_vm0, %v147_v21, 0.0 }
 0x121   :  { %149 = vadd.xlane.f32.xlu0 %v148_v22 }
 0x194   :  { %v150_v24 = vpop.xlane.xlu0 %149 }
 0x195   :  { %v155_v25 = vadd.f32 %v193_v23, %v150_v24 }
 0x197   :  { %v156_v26 = vsub.f32 0.0, %v155_v25 }
 0x199   :  { %v157_v27 = vmul.f32 1.442695, %v156_v26 }
 0x19b   :  { %194 = vpow2.f32 %v157_v27 }
 0x1a1   :  { %v195_v28 = vpop.eup %194 }
 0x1a2   :  { %v159_v29 = vadd.f32 1.0, %v195_v28 }
 0x1a4   :  { %196 = vrcp.f32 %v159_v29  ;;  %v171_v33 = vand.u32 2147483648, %v159_v29  ;;  %v169_v35 = vand.u32 2147483647, %v159_v29  ;;  %vm165_vm4 = vweird.f32 %v159_v29 }
 0x1a6   :  { %v172_v37 = vor.u32 1.1754944e-38, %v171_v33  ;;  %vm170_vm7 = vcmp.eq.f32.partialorder %v169_v35, 8.507059e+37 }
 0x1aa   :  { %v197_v30 = vpop.eup %196 }
 0x1ab   :  { %v161_v31 = vmul.f32 %v197_v30, %v159_v29  ;;  %vm166_vm3 = vweird.f32 %v197_v30 }
 0x1ac   :  { %vm167_vm5 = vmor %vm165_vm4, %vm166_vm3 }
 0x1ad   :  { %v162_v32 = vsub.f32 1.0, %v161_v31 }
 0x1af   :  { %v163_v34 = vmul.f32 %v197_v30, %v162_v32 }
 0x1b1   :  { %v164_v36 = vadd.f32 %v197_v30, %v163_v34 }
 0x1b3   :  { %v168_v38 = vsel %vm167_vm5, %v197_v30, %v164_v36 }
 0x1b4   :  { %v173_v39 = vsel %vm170_vm7, %v172_v37, %v168_v38 }
 0x1b5   :  { %176 = vst.msk [vmem:[%s353_s7] sm:$0xff] %vm175_vm6, %v173_v39 }
 0x1b6   :  { %181 = vsyncpa [#allocation4], 1 }
 0x1b7   :  { %182 = vsyncpa [#allocation6], 1 }

</bundles_post_ra>
